<compile_context>
chip_gen: v7x
topology: tpu7x:2x2x1
jax: 0.10.0
libtpu: 0.0.40
codegen_flags: <defaults>
</compile_context>

<pallas_src>
import functools

import jax
import jax.numpy as jnp
from jax import lax
from jax.experimental import pallas as pl
from jax.experimental.pallas import tpu as pltpu

EPS = 1e-5   # nn.BatchNorm2d default eps
LANE = 128


def _round_up(x, m):
    return (x + m - 1) // m * m


# --------------------------------------------------------------------------
# Pass 1: conv-as-matmul + accumulate BN statistics, finalize scale/shift.
# --------------------------------------------------------------------------
def _conv_stats_kernel(patches_ref, w_ref, gamma_ref, beta_ref,
                       y_ref, scale_ref, shift_ref,
                       sum_sc, sq_sc, *, inv_p, eps):
    pid = pl.program_id(0)

    @pl.when(pid == 0)
    def _():
        sum_sc[...] = jnp.zeros_like(sum_sc)
        sq_sc[...] = jnp.zeros_like(sq_sc)

    # bf16 x bf16 -> f32 accumulate on the MXU.
    y = jnp.dot(patches_ref[...], w_ref[...],
                preferred_element_type=jnp.float32)
    y_ref[...] = y

    # Per-channel running sums (BN stats are over all N*Ho*Wo rows).
    sum_sc[...] += jnp.sum(y, axis=0, keepdims=True)
    sq_sc[...] += jnp.sum(y * y, axis=0, keepdims=True)

    @pl.when(pid == pl.num_programs(0) - 1)
    def _():
        mean = sum_sc[...] * inv_p
        var = jnp.maximum(sq_sc[...] * inv_p - mean * mean, 0.0)
        scale = gamma_ref[...] * lax.rsqrt(var + eps)
        scale_ref[...] = scale
        shift_ref[...] = beta_ref[...] - mean * scale


# --------------------------------------------------------------------------
# Pass 2: apply y * scale + shift (single fused multiply-add per element).
# --------------------------------------------------------------------------
def _normalize_kernel(y_ref, scale_ref, shift_ref, o_ref):
    o_ref[...] = y_ref[...] * scale_ref[...] + shift_ref[...]


# --------------------------------------------------------------------------
# im2col (plain-JAX glue; patches materialized in bf16).
# --------------------------------------------------------------------------
def _im2col(x_nhwc, kh, kw, stride, padding, dilation):
    N, H, W, C = x_nhwc.shape
    xp = jnp.pad(x_nhwc, ((0, 0), (padding, padding), (padding, padding), (0, 0)))
    Hp, Wp = H + 2 * padding, W + 2 * padding
    Ho = (Hp - dilation * (kh - 1) - 1) // stride + 1
    Wo = (Wp - dilation * (kw - 1) - 1) // stride + 1
    cols = []
    for i in range(kh):
        for j in range(kw):
            di, dj = i * dilation, j * dilation
            sl = xp[:, di:di + (Ho - 1) * stride + 1:stride,
                       dj:dj + (Wo - 1) * stride + 1:stride, :]
            cols.append(sl)
    patches = jnp.concatenate(cols, axis=-1)        # last axis = (kh, kw, Cin)
    return patches.reshape(N * Ho * Wo, kh * kw * C), (N, Ho, Wo)


@functools.partial(jax.jit,
                   static_argnames=("stride", "padding", "dilation", "tm"))
def basic_conv2d(x_nchw, weight, gamma, beta, *, stride=1, padding=0,
                 dilation=1, tm=512):
    """Forward of BasicConv2d.  weight is PyTorch-layout [Cout, Cin, kh, kw]."""
    assert tm % 8 == 0
    Cout, Cin, kh, kw = weight.shape

    # NHWC, bf16 on the matmul path.
    x_nhwc = jnp.transpose(x_nchw, (0, 2, 3, 1)).astype(jnp.bfloat16)
    patches, (N, Ho, Wo) = _im2col(x_nhwc, kh, kw, stride, padding, dilation)
    P, K = patches.shape

    # Lane/tile padding.
    K_pad = max(LANE, _round_up(K, LANE))
    C_pad = max(LANE, _round_up(Cout, LANE))
    P_pad = _round_up(P, tm)
    grid = (P_pad // tm,)

    patches_p = jnp.pad(patches, ((0, P_pad - P), (0, K_pad - K)))
    # Weight reordered to match patch last-axis order (kh, kw, Cin) -> [K, Cout].
    w_mat = jnp.transpose(weight, (2, 3, 1, 0)).reshape(K, Cout)
    w_mat = jnp.pad(w_mat.astype(jnp.bfloat16),
                    ((0, K_pad - K), (0, C_pad - Cout)))
    g = jnp.pad(gamma.reshape(1, Cout).astype(jnp.float32),
                ((0, 0), (0, C_pad - Cout)))
    b = jnp.pad(beta.reshape(1, Cout).astype(jnp.float32),
                ((0, 0), (0, C_pad - Cout)))

    # ---- Pass 1: matmul + BN statistics ------------------------------------
    y_f32, scale, shift = pl.pallas_call(
        functools.partial(_conv_stats_kernel, inv_p=1.0 / P, eps=EPS),
        out_shape=(
            jax.ShapeDtypeStruct((P_pad, C_pad), jnp.float32),
            jax.ShapeDtypeStruct((1, C_pad), jnp.float32),
            jax.ShapeDtypeStruct((1, C_pad), jnp.float32),
        ),
        grid=grid,
        in_specs=[
            pl.BlockSpec((tm, K_pad), lambda i: (i, 0)),
            pl.BlockSpec((K_pad, C_pad), lambda i: (0, 0)),
            pl.BlockSpec((1, C_pad), lambda i: (0, 0)),
            pl.BlockSpec((1, C_pad), lambda i: (0, 0)),
        ],
        out_specs=(
            pl.BlockSpec((tm, C_pad), lambda i: (i, 0)),
            pl.BlockSpec((1, C_pad), lambda i: (0, 0)),
            pl.BlockSpec((1, C_pad), lambda i: (0, 0)),
        ),
        scratch_shapes=[
            pltpu.VMEM((1, C_pad), jnp.float32),   # per-channel sum
            pltpu.VMEM((1, C_pad), jnp.float32),   # per-channel sum of squares
        ],
        compiler_params=pltpu.CompilerParams(
            dimension_semantics=("arbitrary",)),
        cost_estimate=pl.CostEstimate(
            flops=2 * P_pad * K_pad * C_pad,
            transcendentals=C_pad,
            bytes_accessed=(P_pad * K_pad * 2 + K_pad * C_pad * 2
                            + P_pad * C_pad * 4)),
    )(patches_p, w_mat, g, b)

    # ---- Pass 2: normalize (pure streaming, megacore-parallel) -------------
    out_p = pl.pallas_call(
        _normalize_kernel,
        out_shape=jax.ShapeDtypeStruct((P_pad, C_pad), jnp.float32),
        grid=grid,
        in_specs=[
            pl.BlockSpec((tm, C_pad), lambda i: (i, 0)),
            pl.BlockSpec((1, C_pad), lambda i: (0, 0)),
            pl.BlockSpec((1, C_pad), lambda i: (0, 0)),
        ],
        out_specs=pl.BlockSpec((tm, C_pad), lambda i: (i, 0)),
        compiler_params=pltpu.CompilerParams(
            dimension_semantics=("parallel",)),
        cost_estimate=pl.CostEstimate(
            flops=2 * P_pad * C_pad,
            transcendentals=0,
            bytes_accessed=2 * P_pad * C_pad * 4),
    )(y_f32, scale, shift)

    out = out_p[:P, :Cout].reshape(N, Ho, Wo, Cout)
    return jnp.transpose(out, (0, 3, 1, 2))   # back to NCHW


# --------------------------------------------------------------------------
# Pure-JAX reference (f32 conv + training-mode BatchNorm2d).
# --------------------------------------------------------------------------
def _reference(x, w, gamma, beta, *, stride, padding, dilation):
    y = lax.conv_general_dilated(
        x.astype(jnp.float32), w.astype(jnp.float32),
        window_strides=(stride, stride),
        padding=[(padding, padding), (padding, padding)],
        rhs_dilation=(dilation, dilation),
        dimension_numbers=("NCHW", "OIHW", "NCHW"))
    mean = jnp.mean(y, axis=(0, 2, 3), keepdims=True)
    var = jnp.mean(jnp.square(y - mean), axis=(0, 2, 3), keepdims=True)
    return (gamma.reshape(1, -1, 1, 1) * (y - mean) * lax.rsqrt(var + EPS)
            + beta.reshape(1, -1, 1, 1))


if __name__ == "__main__":
    # BasicConv2d(in_planes=4, out_planes=8, kernel_size=3, stride=1, padding=1)
    N, Cin, H, W = 2, 4, 16, 16
    Cout, kh, kw = 8, 3, 3
    stride, padding, dilation = 1, 1, 1

    key = jax.random.PRNGKey(0)
    kx, kw_key = jax.random.split(key)

    x = jax.random.normal(kx, (N, Cin, H, W), dtype=jnp.float32)

    # Conv2d weight: kaiming_normal_(mode='fan_in', nonlinearity='relu'),
    # bias=False.  BatchNorm2d: gamma=1, beta=0.
    fan_in = Cin * kh * kw
    w = jax.random.normal(kw_key, (Cout, Cin, kh, kw), dtype=jnp.float32)
    w = w * jnp.sqrt(2.0 / fan_in)
    gamma = jnp.ones((Cout,), dtype=jnp.float32)
    beta = jnp.zeros((Cout,), dtype=jnp.float32)

    # Small tile so the multi-step grid + BN accumulation path is exercised
    # (P = 2*16*16 = 512 rows -> 4 grid steps of 128 rows each).
    out = jax.block_until_ready(
        basic_conv2d(x, w, gamma, beta, stride=stride, padding=padding,
                     dilation=dilation, tm=128))
    assert out.shape == (N, Cout, H, W), out.shape

    # Tight check: reference on the same bf16-quantized matmul inputs
    # (isolates the kernel's conv + BN structure from bf16 rounding).
    x_q = x.astype(jnp.bfloat16).astype(jnp.float32)
    w_q = w.astype(jnp.bfloat16).astype(jnp.float32)
    ref_q = jax.block_until_ready(
        _reference(x_q, w_q, gamma, beta, stride=stride, padding=padding,
                   dilation=dilation))
    err_q = float(jnp.max(jnp.abs(out - ref_q)))
    assert err_q < 2e-3, err_q

    # Coarse check against the full-f32 module forward (bf16 matmul inputs).
    ref = jax.block_until_ready(
        _reference(x, w, gamma, beta, stride=stride, padding=padding,
                   dilation=dilation))
    err_f = float(jnp.max(jnp.abs(out - ref)))
    assert err_f < 1e-1, err_f

    print("KERNEL_OK")
</pallas_src>

<mosaic_0001>
module attributes {stable_mosaic.version = 11 : i64} {
  func.func @_conv_stats_kernel(%arg0: i32, %arg1: memref<128x128xbf16, #tpu.memory_space<vmem>>, %arg2: memref<128x128xbf16, #tpu.memory_space<vmem>>, %arg3: memref<1x128xf32, #tpu.memory_space<vmem>>, %arg4: memref<1x128xf32, #tpu.memory_space<vmem>>, %arg5: memref<128x128xf32, #tpu.memory_space<vmem>>, %arg6: memref<1x128xf32, #tpu.memory_space<vmem>>, %arg7: memref<1x128xf32, #tpu.memory_space<vmem>>, %arg8: memref<1x128xf32, #tpu.memory_space<vmem>>, %arg9: memref<1x128xf32, #tpu.memory_space<vmem>>) attributes {dimension_semantics = [#tpu.dimension_semantics<arbitrary>], iteration_bounds = array<i64: 4>, scalar_prefetch = 0 : i64, scratch_operands = 2 : i64, tpu.core_type = #tpu.core_type<tc>, window_params = [{transform_indices = @transform_0, window_bounds = array<i64: 128, 128>}, {pipeline_mode = #tpu.pipeline_mode<synchronous>, transform_indices = @transform_1, window_bounds = array<i64: 128, 128>}, {pipeline_mode = #tpu.pipeline_mode<synchronous>, transform_indices = @transform_2, window_bounds = array<i64: 1, 128>}, {pipeline_mode = #tpu.pipeline_mode<synchronous>, transform_indices = @transform_3, window_bounds = array<i64: 1, 128>}, {transform_indices = @transform_4, window_bounds = array<i64: 128, 128>}, {pipeline_mode = #tpu.pipeline_mode<synchronous>, transform_indices = @transform_5, window_bounds = array<i64: 1, 128>}, {pipeline_mode = #tpu.pipeline_mode<synchronous>, transform_indices = @transform_6, window_bounds = array<i64: 1, 128>}]} {
    %c0_i32 = arith.constant 0 : i32
    %0 = arith.cmpi eq, %arg0, %c0_i32 : i32
    %1 = arith.extui %0 : i1 to i32
    %c0_i32_0 = arith.constant 0 : i32
    %2 = arith.cmpi ne, %1, %c0_i32_0 : i32
    scf.if %2 {
      %cst_17 = arith.constant 0.000000e+00 : f32
      %21 = vector.broadcast %cst_17 : f32 to vector<1x128xf32>
      %c0_18 = arith.constant 0 : index
      %c0_19 = arith.constant 0 : index
      %22 = vector.load %arg8[%c0_18, %c0_19] : memref<1x128xf32, #tpu.memory_space<vmem>>, vector<1x128xf32>
      tpu.vector_store %arg8[%c0_18, %c0_19], %21 {strides = array<i32>} : memref<1x128xf32, #tpu.memory_space<vmem>>, vector<1x128xf32>,
      %cst_20 = arith.constant 0.000000e+00 : f32
      %23 = vector.broadcast %cst_20 : f32 to vector<1x128xf32>
      %c0_21 = arith.constant 0 : index
      %c0_22 = arith.constant 0 : index
      %24 = vector.load %arg9[%c0_21, %c0_22] : memref<1x128xf32, #tpu.memory_space<vmem>>, vector<1x128xf32>
      tpu.vector_store %arg9[%c0_21, %c0_22], %23 {strides = array<i32>} : memref<1x128xf32, #tpu.memory_space<vmem>>, vector<1x128xf32>,
    } else {
    }
    %c0 = arith.constant 0 : index
    %c0_1 = arith.constant 0 : index
    %3 = vector.load %arg1[%c0, %c0_1] : memref<128x128xbf16, #tpu.memory_space<vmem>>, vector<128x128xbf16>
    %c0_2 = arith.constant 0 : index
    %c0_3 = arith.constant 0 : index
    %4 = vector.load %arg2[%c0_2, %c0_3] : memref<128x128xbf16, #tpu.memory_space<vmem>>, vector<128x128xbf16>
    %cst = arith.constant dense<0.000000e+00> : vector<128x128xf32>
    %5 = tpu.matmul %3, %4, %cst {dimension_numbers = #tpu.dot_dimension_numbers<[1], [0], [0], [1], [0, 0, 1, 1], [], []>} : vector<128x128xbf16>, vector<128x128xbf16>, vector<128x128xf32> -> vector<128x128xf32>
    %c0_4 = arith.constant 0 : index
    %c0_5 = arith.constant 0 : index
    %6 = vector.load %arg5[%c0_4, %c0_5] : memref<128x128xf32, #tpu.memory_space<vmem>>, vector<128x128xf32>
    tpu.vector_store %arg5[%c0_4, %c0_5], %5 {strides = array<i32>} : memref<128x128xf32, #tpu.memory_space<vmem>>, vector<128x128xf32>,
    %c0_6 = arith.constant 0 : index
    %c0_7 = arith.constant 0 : index
    %7 = vector.load %arg8[%c0_6, %c0_7] : memref<1x128xf32, #tpu.memory_space<vmem>>, vector<1x128xf32>
    %cst_8 = arith.constant dense<0.000000e+00> : vector<128xf32>
    %8 = vector.multi_reduction <add>, %5, %cst_8 [0] : vector<128x128xf32> to vector<128xf32>
    %9 = vector.shape_cast %8 : vector<128xf32> to vector<1x128xf32>
    %10 = arith.addf %7, %9 : vector<1x128xf32>
    %c0_9 = arith.constant 0 : index
    %c0_10 = arith.constant 0 : index
    %11 = vector.load %arg8[%c0_9, %c0_10] : memref<1x128xf32, #tpu.memory_space<vmem>>, vector<1x128xf32>
    tpu.vector_store %arg8[%c0_9, %c0_10], %10 {strides = array<i32>} : memref<1x128xf32, #tpu.memory_space<vmem>>, vector<1x128xf32>,
    %c0_11 = arith.constant 0 : index
    %c0_12 = arith.constant 0 : index
    %12 = vector.load %arg9[%c0_11, %c0_12] : memref<1x128xf32, #tpu.memory_space<vmem>>, vector<1x128xf32>
    %13 = arith.mulf %5, %5 : vector<128x128xf32>
    %cst_13 = arith.constant dense<0.000000e+00> : vector<128xf32>
    %14 = vector.multi_reduction <add>, %13, %cst_13 [0] : vector<128x128xf32> to vector<128xf32>
    %15 = vector.shape_cast %14 : vector<128xf32> to vector<1x128xf32>
    %16 = arith.addf %12, %15 : vector<1x128xf32>
    %c0_14 = arith.constant 0 : index
    %c0_15 = arith.constant 0 : index
    %17 = vector.load %arg9[%c0_14, %c0_15] : memref<1x128xf32, #tpu.memory_space<vmem>>, vector<1x128xf32>
    tpu.vector_store %arg9[%c0_14, %c0_15], %16 {strides = array<i32>} : memref<1x128xf32, #tpu.memory_space<vmem>>, vector<1x128xf32>,
    %c3_i32 = arith.constant 3 : i32
    %18 = arith.cmpi eq, %arg0, %c3_i32 : i32
    %19 = arith.extui %18 : i1 to i32
    %c0_i32_16 = arith.constant 0 : i32
    %20 = arith.cmpi ne, %19, %c0_i32_16 : i32
    scf.if %20 {
      %c0_17 = arith.constant 0 : index
      %c0_18 = arith.constant 0 : index
      %21 = vector.load %arg8[%c0_17, %c0_18] : memref<1x128xf32, #tpu.memory_space<vmem>>, vector<1x128xf32>
      %cst_19 = arith.constant 0.001953125 : f32
      %22 = vector.broadcast %cst_19 : f32 to vector<1x128xf32>
      %23 = arith.mulf %21, %22 : vector<1x128xf32>
      %c0_20 = arith.constant 0 : index
      %c0_21 = arith.constant 0 : index
      %24 = vector.load %arg9[%c0_20, %c0_21] : memref<1x128xf32, #tpu.memory_space<vmem>>, vector<1x128xf32>
      %cst_22 = arith.constant 0.001953125 : f32
      %25 = vector.broadcast %cst_22 : f32 to vector<1x128xf32>
      %26 = arith.mulf %24, %25 : vector<1x128xf32>
      %27 = arith.mulf %23, %23 : vector<1x128xf32>
      %28 = arith.subf %26, %27 : vector<1x128xf32>
      %cst_23 = arith.constant 0.000000e+00 : f32
      %29 = vector.broadcast %cst_23 : f32 to vector<1x128xf32>
      %30 = arith.maximumf %28, %29 : vector<1x128xf32>
      %c0_24 = arith.constant 0 : index
      %c0_25 = arith.constant 0 : index
      %31 = vector.load %arg3[%c0_24, %c0_25] : memref<1x128xf32, #tpu.memory_space<vmem>>, vector<1x128xf32>
      %cst_26 = arith.constant 9.99999974E-6 : f32
      %32 = vector.broadcast %cst_26 : f32 to vector<1x128xf32>
      %33 = arith.addf %30, %32 : vector<1x128xf32>
      %34 = math.rsqrt %33 : vector<1x128xf32>
      %35 = arith.mulf %31, %34 : vector<1x128xf32>
      %c0_27 = arith.constant 0 : index
      %c0_28 = arith.constant 0 : index
      %36 = vector.load %arg6[%c0_27, %c0_28] : memref<1x128xf32, #tpu.memory_space<vmem>>, vector<1x128xf32>
      tpu.vector_store %arg6[%c0_27, %c0_28], %35 {strides = array<i32>} : memref<1x128xf32, #tpu.memory_space<vmem>>, vector<1x128xf32>,
      %c0_29 = arith.constant 0 : index
      %c0_30 = arith.constant 0 : index
      %37 = vector.load %arg4[%c0_29, %c0_30] : memref<1x128xf32, #tpu.memory_space<vmem>>, vector<1x128xf32>
      %38 = arith.mulf %23, %35 : vector<1x128xf32>
      %39 = arith.subf %37, %38 : vector<1x128xf32>
      %c0_31 = arith.constant 0 : index
      %c0_32 = arith.constant 0 : index
      %40 = vector.load %arg7[%c0_31, %c0_32] : memref<1x128xf32, #tpu.memory_space<vmem>>, vector<1x128xf32>
      tpu.vector_store %arg7[%c0_31, %c0_32], %39 {strides = array<i32>} : memref<1x128xf32, #tpu.memory_space<vmem>>, vector<1x128xf32>,
    } else {
    }
    return
  }
  func.func @transform_0(%arg0: i32) -> (i32, i32) {
    %c0_i32 = arith.constant 0 : i32
    %c0_i32_0 = arith.constant 0 : i32
    return %arg0, %c0_i32 : i32, i32
  }
  func.func @transform_1(%arg0: i32) -> (i32, i32) {
    %c0_i32 = arith.constant 0 : i32
    %c0_i32_0 = arith.constant 0 : i32
    %c0_i32_1 = arith.constant 0 : i32
    return %c0_i32, %c0_i32_0 : i32, i32
  }
  func.func @transform_2(%arg0: i32) -> (i32, i32) {
    %c0_i32 = arith.constant 0 : i32
    %c0_i32_0 = arith.constant 0 : i32
    %c0_i32_1 = arith.constant 0 : i32
    return %c0_i32, %c0_i32_0 : i32, i32
  }
  func.func @transform_3(%arg0: i32) -> (i32, i32) {
    %c0_i32 = arith.constant 0 : i32
    %c0_i32_0 = arith.constant 0 : i32
    %c0_i32_1 = arith.constant 0 : i32
    return %c0_i32, %c0_i32_0 : i32, i32
  }
  func.func @transform_4(%arg0: i32) -> (i32, i32) {
    %c0_i32 = arith.constant 0 : i32
    %c0_i32_0 = arith.constant 0 : i32
    return %arg0, %c0_i32 : i32, i32
  }
  func.func @transform_5(%arg0: i32) -> (i32, i32) {
    %c0_i32 = arith.constant 0 : i32
    %c0_i32_0 = arith.constant 0 : i32
    %c0_i32_1 = arith.constant 0 : i32
    return %c0_i32, %c0_i32_0 : i32, i32
  }
  func.func @transform_6(%arg0: i32) -> (i32, i32) {
    %c0_i32 = arith.constant 0 : i32
    %c0_i32_0 = arith.constant 0 : i32
    %c0_i32_1 = arith.constant 0 : i32
    return %c0_i32, %c0_i32_0 : i32, i32
  }
}

module attributes {stable_mosaic.version = 11 : i64} {
  func.func @_normalize_kernel(%arg0: i32, %arg1: memref<128x128xf32, #tpu.memory_space<vmem>>, %arg2: memref<1x128xf32, #tpu.memory_space<vmem>>, %arg3: memref<1x128xf32, #tpu.memory_space<vmem>>, %arg4: memref<128x128xf32, #tpu.memory_space<vmem>>) attributes {dimension_semantics = [#tpu.dimension_semantics<parallel>], iteration_bounds = array<i64: 4>, scalar_prefetch = 0 : i64, scratch_operands = 0 : i64, tpu.core_type = #tpu.core_type<tc>, window_params = [{transform_indices = @transform_0, window_bounds = array<i64: 128, 128>}, {pipeline_mode = #tpu.pipeline_mode<synchronous>, transform_indices = @transform_1, window_bounds = array<i64: 1, 128>}, {pipeline_mode = #tpu.pipeline_mode<synchronous>, transform_indices = @transform_2, window_bounds = array<i64: 1, 128>}, {transform_indices = @transform_3, window_bounds = array<i64: 128, 128>}]} {
    %c0 = arith.constant 0 : index
    %c0_0 = arith.constant 0 : index
    %0 = vector.load %arg1[%c0, %c0_0] : memref<128x128xf32, #tpu.memory_space<vmem>>, vector<128x128xf32>
    %c0_1 = arith.constant 0 : index
    %c0_2 = arith.constant 0 : index
    %1 = vector.load %arg2[%c0_1, %c0_2] : memref<1x128xf32, #tpu.memory_space<vmem>>, vector<1x128xf32>
    %2 = vector.broadcast %1 : vector<1x128xf32> to vector<128x128xf32>
    %3 = arith.mulf %0, %2 : vector<128x128xf32>
    %c0_3 = arith.constant 0 : index
    %c0_4 = arith.constant 0 : index
    %4 = vector.load %arg3[%c0_3, %c0_4] : memref<1x128xf32, #tpu.memory_space<vmem>>, vector<1x128xf32>
    %5 = vector.broadcast %4 : vector<1x128xf32> to vector<128x128xf32>
    %6 = arith.addf %3, %5 : vector<128x128xf32>
    %c0_5 = arith.constant 0 : index
    %c0_6 = arith.constant 0 : index
    %7 = vector.load %arg4[%c0_5, %c0_6] : memref<128x128xf32, #tpu.memory_space<vmem>>, vector<128x128xf32>
    tpu.vector_store %arg4[%c0_5, %c0_6], %6 {strides = array<i32>} : memref<128x128xf32, #tpu.memory_space<vmem>>, vector<128x128xf32>,
    return
  }
  func.func @transform_0(%arg0: i32) -> (i32, i32) {
    %c0_i32 = arith.constant 0 : i32
    %c0_i32_0 = arith.constant 0 : i32
    return %arg0, %c0_i32 : i32, i32
  }
  func.func @transform_1(%arg0: i32) -> (i32, i32) {
    %c0_i32 = arith.constant 0 : i32
    %c0_i32_0 = arith.constant 0 : i32
    %c0_i32_1 = arith.constant 0 : i32
    return %c0_i32, %c0_i32_0 : i32, i32
  }
  func.func @transform_2(%arg0: i32) -> (i32, i32) {
    %c0_i32 = arith.constant 0 : i32
    %c0_i32_0 = arith.constant 0 : i32
    %c0_i32_1 = arith.constant 0 : i32
    return %c0_i32, %c0_i32_0 : i32, i32
  }
  func.func @transform_3(%arg0: i32) -> (i32, i32) {
    %c0_i32 = arith.constant 0 : i32
    %c0_i32_0 = arith.constant 0 : i32
    return %arg0, %c0_i32 : i32, i32
  }
}

</mosaic_0001>

<bundles_post_ra>
// kernel: basic_conv2d.3
= control target key start
LH: loop header
LB: loop body
LE: loop exit
PB: predicated region body
PF: predicated region fallthrough
CT: control target
= control target key end

     0   :  { %s357_s12 = smov 0   ;;  %s434_s0 = inlined_call_operand.vmem [shape: f32[512,128], index: 0, kind: input, shape index: {}]   ;;  %s435_s1 = inlined_call_operand.vmem [shape: f32[1,128], index: 1, kind: input, shape index: {}]   ;;  %s436_s2 = inlined_call_operand.vmem [shape: f32[1,128], index: 2, kind: input, shape index: {}]   ;;  %s437_s3 = inlined_call_operand.vmem [shape: f32[512,128], index: 3, kind: output, shape index: {}]  }
   0x1 LB: > { %s308_s13 = sadd.s32 4294967295, %s335_s12   ;;  %p312_p0 = scmp.ge.s32.totalorder %s335_s12, 1  ;;  %s335_s12 = sphi %s357_s12, %s13_s12  }
   0x2   : > { %p138_p1 = scmp.lt.s32.totalorder %s335_s12, 5 }
   0x4   : > { %p139_p2 = pnand %p312_p0, %p138_p1 }
   0x5   : > { %s313_s14 = sshll.u32 (!%p139_p2), %s308_s13, 4  ;;  %v317_v0 = vld [vmem:[%s435_s1] ss:$0 sm:$0xff] (!%p139_p2) }
   0x6   : > { %142 = sbr.rel (%p139_p2) target bundleno = 30 (0x1e), region = 32  ;;  %p163_p3 = scmp.lt.s32.totalorder (!%p139_p2), %s313_s14, 63  ;;  %v376_v1 = vld [vmem:[%s436_s2] ss:$0 sm:$0xff] (!%p139_p2) }
   0xd   : > { %s439_s14 = smov (!%p163_p3, %s313_s14), 63 }
   0xe   : > { %s314_s15 = sshll.u32 %s439_s14, 3 }
   0xf   : > { %s371_s20 = scalar_lea.vmem %s434_s0, %s314_s15  ;;  %s387_s25 = scalar_lea.vmem %s437_s3, %s314_s15 }
  0x10   : > { %v174_v2 = vld [vmem:[%s371_s20] sm:$0xff]  ;;  %v175_v3 = vld [vmem:[%s371_s20 + $0x8] sm:$0xff]  ;;  %v176_v4 = vld [vmem:[%s371_s20 + $0x10] sm:$0xff] }
  0x11   : > { %v197_v5 = vmul.f32 %v317_v0, %v174_v2  ;;  %v198_v6 = vmul.f32 %v317_v0, %v175_v3  ;;  %v199_v7 = vmul.f32 %v317_v0, %v176_v4  ;;  %v177_v8 = vld [vmem:[%s371_s20 + $0x18] sm:$0xff]  ;;  %v178_v9 = vld [vmem:[%s371_s20 + $0x20] sm:$0xff]  ;;  %v179_v10 = vld [vmem:[%s371_s20 + $0x28] sm:$0xff] }
  0x12   : > { %v200_v11 = vmul.f32 %v317_v0, %v177_v8  ;;  %v201_v12 = vmul.f32 %v317_v0, %v178_v9  ;;  %v202_v13 = vmul.f32 %v317_v0, %v179_v10  ;;  %v180_v14 = vld [vmem:[%s371_s20 + $0x30] sm:$0xff]  ;;  %v181_v15 = vld [vmem:[%s371_s20 + $0x38] sm:$0xff]  ;;  %v182_v16 = vld [vmem:[%s371_s20 + $0x40] sm:$0xff] }
  0x13   : > { %v220_v17 = vadd.f32 %v376_v1, %v197_v5  ;;  %v221_v18 = vadd.f32 %v376_v1, %v198_v6  ;;  %v222_v19 = vadd.f32 %v376_v1, %v199_v7  ;;  %v203_v20 = vmul.f32 %v317_v0, %v180_v14  ;;  %v183_v21 = vld [vmem:[%s371_s20 + $0x48] sm:$0xff]  ;;  %v184_v22 = vld [vmem:[%s371_s20 + $0x50] sm:$0xff]  ;;  %v185_v23 = vld [vmem:[%s371_s20 + $0x58] sm:$0xff] }
  0x14   : > { %v223_v24 = vadd.f32 %v376_v1, %v200_v11  ;;  %v224_v25 = vadd.f32 %v376_v1, %v201_v12  ;;  %v225_v26 = vadd.f32 %v376_v1, %v202_v13  ;;  %v204_v27 = vmul.f32 %v317_v0, %v181_v15  ;;  %v186_v28 = vld [vmem:[%s371_s20 + $0x60] sm:$0xff]  ;;  %v187_v29 = vld [vmem:[%s371_s20 + $0x68] sm:$0xff]  ;;  %v188_v30 = vld [vmem:[%s371_s20 + $0x70] sm:$0xff] }
  0x15   : > { %236 = vst [vmem:[%s387_s25] sm:$0xff] %v220_v17  ;;  %237 = vst [vmem:[%s387_s25 + $0x8] sm:$0xff] %v221_v18  ;;  %v226_v31 = vadd.f32 %v376_v1, %v203_v20  ;;  %v205_v32 = vmul.f32 %v317_v0, %v182_v16  ;;  %v206_v33 = vmul.f32 %v317_v0, %v183_v21  ;;  %v189_v35 = vld [vmem:[%s371_s20 + $0x78] sm:$0xff] }
  0x16   : > { %238 = vst [vmem:[%s387_s25 + $0x10] sm:$0xff] %v222_v19  ;;  %v207_v34 = vmul.f32 %v317_v0, %v184_v22  ;;  %239 = vst [vmem:[%s387_s25 + $0x18] sm:$0xff] %v223_v24  ;;  %v227_v36 = vadd.f32 %v376_v1, %v204_v27  ;;  %v208_v37 = vmul.f32 %v317_v0, %v185_v23 }
  0x17   : > { %240 = vst [vmem:[%s387_s25 + $0x20] sm:$0xff] %v224_v25  ;;  %241 = vst [vmem:[%s387_s25 + $0x28] sm:$0xff] %v225_v26  ;;  %v209_v38 = vmul.f32 %v317_v0, %v186_v28  ;;  %v210_v39 = vmul.f32 %v317_v0, %v187_v29  ;;  %v228_v40 = vadd.f32 %v376_v1, %v205_v32 }
  0x18   : > { %242 = vst [vmem:[%s387_s25 + $0x30] sm:$0xff] %v226_v31  ;;  %v229_v41 = vadd.f32 %v376_v1, %v206_v33  ;;  %v230_v42 = vadd.f32 %v376_v1, %v207_v34  ;;  %v211_v43 = vmul.f32 %v317_v0, %v188_v30  ;;  %243 = vst [vmem:[%s387_s25 + $0x38] sm:$0xff] %v227_v36 }
  0x19   : > { %v231_v44 = vadd.f32 %v376_v1, %v208_v37  ;;  %v232_v45 = vadd.f32 %v376_v1, %v209_v38  ;;  %v233_v46 = vadd.f32 %v376_v1, %v210_v39  ;;  %v212_v47 = vmul.f32 %v317_v0, %v189_v35  ;;  %244 = vst [vmem:[%s387_s25 + $0x40] sm:$0xff] %v228_v40 }
  0x1a   : > { %245 = vst [vmem:[%s387_s25 + $0x48] sm:$0xff] %v229_v41  ;;  %246 = vst [vmem:[%s387_s25 + $0x50] sm:$0xff] %v230_v42  ;;  %v234_v48 = vadd.f32 %v376_v1, %v211_v43 }
  0x1b   : > { %247 = vst [vmem:[%s387_s25 + $0x58] sm:$0xff] %v231_v44  ;;  %248 = vst [vmem:[%s387_s25 + $0x60] sm:$0xff] %v232_v45  ;;  %v235_v49 = vadd.f32 %v376_v1, %v212_v47 }
  0x1c   : > { %249 = vst [vmem:[%s387_s25 + $0x68] sm:$0xff] %v233_v46  ;;  %250 = vst [vmem:[%s387_s25 + $0x70] sm:$0xff] %v234_v48 }
  0x1d   : > { %251 = vst [vmem:[%s387_s25 + $0x78] sm:$0xff] %v235_v49 }
  0x1e PF: > { %s13_s12 = sadd.s32 1, %s335_s12  }
  0x1f   : > { %p10_p4 = scmp.ge.s32.totalorder %s13_s12, 6  }
  0x21   :  { %12 = sbr.rel (!%p10_p4) target bundleno = 1 (0x1), region = 62 }

// kernel: basic_conv2d.2
= control target key start
LH: loop header
LB: loop body
LE: loop exit
PB: predicated region body
PF: predicated region fallthrough
CT: control target
= control target key end

     0   :  { %s814_s21 = smov 0   ;;  %s900_s0 = inlined_call_operand.vmem [shape: bf16[512,128], index: 0, kind: input, shape index: {}]   ;;  %s901_s1 = inlined_call_operand.vmem [shape: bf16[128,128], index: 1, kind: input, shape index: {}]   ;;  %s902_s2 = inlined_call_operand.vmem [shape: f32[1,128], index: 2, kind: input, shape index: {}]   ;;  %s903_s3 = inlined_call_operand.vmem [shape: f32[1,128], index: 3, kind: input, shape index: {}]   ;;  %s904_s4 = inlined_call_operand.vmem [shape: f32[512,128], index: 4, kind: output, shape index: {0}]   ;;  %s905_s5 = inlined_call_operand.vmem [shape: f32[1,128], index: 5, kind: output, shape index: {1}]   ;;  %s906_s6 = inlined_call_operand.vmem [shape: f32[1,128], index: 6, kind: output, shape index: {2}]  }
   0x1 LB: > { %s820_s22 = sadd.s32 4294967295, %s776_s21   ;;  %p654_p0 = scmp.ge.s32.totalorder %s776_s21, 1  ;;  %s776_s21 = sphi %s814_s21, %s17_s21  }
   0x2   : > { %p208_p1 = scmp.lt.s32.totalorder %s776_s21, 5 }
   0x4   : > { %p209_p2 = pnand %p654_p0, %p208_p1 }
   0x5   : > { %s655_s23 = sshll.u32 (!%p209_p2), %s820_s22, 4  ;;  %p659_p4 = scmp.ne.s32.totalorder (!%p209_p2), %s820_s22, 0 }
   0x6   : > { %212 = sbr.rel (%p209_p2) target bundleno = 348 (0x15c), region = 36  ;;  %p239_p3 = scmp.lt.s32.totalorder (!%p209_p2), %s655_s23, 63 }
   0xd   : > { %s908_s23 = smov (!%p239_p3, %s655_s23), 63  ;;  %254 = sbr.rel (%p659_p4) target bundleno = 20 (0x14), region = 40 }
   0xe   : > { %s656_s24 = sshll.u32 %s908_s23, 2  ;;  %s658_s25 = sshll.u32 %s908_s23, 3  ;;  %v778_v0 = vmov (!%p659_p4), 0.0  }
   0xf   : > { %s828_s28 = scalar_lea.vmem %s900_s0, %s656_s24  ;;  %s833_s7 = scalar_lea.vmem %s904_s4, %s658_s25  ;;  %255 = vst [vmem:[#allocation2] sm:$0x1] (!%p659_p4), %v778_v0  ;;  %256 = vst [vmem:[#allocation3] sm:$0x1] (!%p659_p4), %v778_v0 }
  0x14 PF: > { %v752_v1 = vld [vmem:[%s901_s1] sm:$0xff]   ;;  %v753_v2 = vld [vmem:[%s901_s1 + $0x8] sm:$0xff]   ;;  %v754_v3 = vld [vmem:[%s901_s1 + $0x10] sm:$0xff]   ;;  %p676_p5 = scmp.ne.s32.totalorder %s820_s22, 3 }
  0x15   : > { %695 = vmatprep.subr.bf16.mxu0 %v752_v1  ;;  %727 = vmatprep.subr.bf16.mxu1 %v752_v1  ;;  %v755_v4 = vld [vmem:[%s901_s1 + $0x18] sm:$0xff]   ;;  %v760_v5 = vld [vmem:[%s828_s28] sm:$0xff]   ;;  %v757_v8 = vld [vmem:[%s901_s1 + $0x28] sm:$0xff]  }
  0x16   : > { %696 = vmatpush3.bf16.msra.mxu0 %v752_v1  ;;  %735 = vmatpush3.bf16.msra.mxu1 %v752_v1  ;;  %v756_v6 = vld [vmem:[%s901_s1 + $0x20] sm:$0xff]   ;;  %v758_v9 = vld [vmem:[%s901_s1 + $0x30] sm:$0xff]   ;;  %v759_v10 = vld [vmem:[%s901_s1 + $0x38] sm:$0xff]  }
  0x17   : > { %697 = vmatprep.subr.bf16.mxu0 %v753_v2  ;;  %728 = vmatprep.subr.bf16.mxu1 %v753_v2  ;;  %v764_v7 = vld [vmem:[%s828_s28 + $0x20] sm:$0xff]   ;;  %v761_v11 = vld [vmem:[%s828_s28 + $0x8] sm:$0xff]   ;;  %v762_v13 = vld [vmem:[%s828_s28 + $0x10] sm:$0xff]  }
  0x18   : > { %711 = vmatprep.mubr.bf16.mxu0 %v760_v5  ;;  %719 = vmatprep.mubr.bf16.mxu1 %v764_v7  ;;  %v765_v12 = vld [vmem:[%s828_s28 + $0x28] sm:$0xff]   ;;  %v766_v14 = vld [vmem:[%s828_s28 + $0x30] sm:$0xff]   ;;  %v763_v15 = vld [vmem:[%s828_s28 + $0x18] sm:$0xff]  }
  0x19   : > { %v767_v16 = vld [vmem:[%s828_s28 + $0x38] sm:$0xff]  }
  0x1a   : > { %698 = vmatpush3.bf16.msra.mxu0 %v753_v2  ;;  %736 = vmatpush3.bf16.msra.mxu1 %v753_v2 }
  0x1b   : > { %699 = vmatprep.subr.bf16.mxu0 %v754_v3  ;;  %729 = vmatprep.subr.bf16.mxu1 %v754_v3 }
  0x1e   : > { %700 = vmatpush3.bf16.msra.mxu0 %v754_v3  ;;  %737 = vmatpush3.bf16.msra.mxu1 %v754_v3 }
  0x1f   : > { %701 = vmatprep.subr.bf16.mxu0 %v755_v4  ;;  %730 = vmatprep.subr.bf16.mxu1 %v755_v4 }
  0x22   : > { %702 = vmatpush3.bf16.msra.mxu0 %v755_v4  ;;  %738 = vmatpush3.bf16.msra.mxu1 %v755_v4 }
  0x23   : > { %703 = vmatprep.subr.bf16.mxu0 %v756_v6  ;;  %731 = vmatprep.subr.bf16.mxu1 %v756_v6 }
  0x26   : > { %704 = vmatpush3.bf16.msra.mxu0 %v756_v6  ;;  %739 = vmatpush3.bf16.msra.mxu1 %v756_v6 }
  0x27   : > { %705 = vmatprep.subr.bf16.mxu0 %v757_v8  ;;  %732 = vmatprep.subr.bf16.mxu1 %v757_v8 }
  0x2a   : > { %706 = vmatpush3.bf16.msra.mxu0 %v757_v8  ;;  %740 = vmatpush3.bf16.msra.mxu1 %v757_v8 }
  0x2b   : > { %707 = vmatprep.subr.bf16.mxu0 %v758_v9  ;;  %733 = vmatprep.subr.bf16.mxu1 %v758_v9 }
  0x2e   : > { %708 = vmatpush3.bf16.msra.mxu0 %v758_v9  ;;  %741 = vmatpush3.bf16.msra.mxu1 %v758_v9 }
  0x2f   : > { %709 = vmatprep.subr.bf16.mxu0 %v759_v10  ;;  %734 = vmatprep.subr.bf16.mxu1 %v759_v10 }
  0x32   : > { %710 = vmatpush3.bf16.msra.mxu0 %v759_v10  ;;  %742 = vmatpush3.bf16.msra.mxu1 %v759_v10 }
  0x35   : > { %712 = vmatmul.mubr.bf16.vlgmr.msra.gmra.mrb[0].mxu0 %v761_v11  ;;  %720 = vmatmul.mubr.bf16.vlgmr.msra.gmra.mrb[0].mxu1 %v765_v12 }
  0x36   : > { %715 = vmatprep.mubr.bf16.mxu0 %v762_v13  ;;  %723 = vmatprep.mubr.bf16.mxu1 %v766_v14 }
  0x3d   : > { %716 = vmatmul.mubr.bf16.gmra.mrb[4].mxu0 %v763_v15  ;;  %724 = vmatmul.mubr.bf16.gmra.mrb[4].mxu1 %v767_v16 }
 0x108   : > { %v713_v17 = vpop.f32.mrb[0].mxu0  ;;  %v721_v18 = vpop.f32.mrb[0].mxu1 }
 0x109   : > { %484 = vst [vmem:[%s833_s7 + $0x10] sm:$0xff] %v713_v17  ;;  %v419_v19 = vpop.f32.mrb[1].mxu0  ;;  %492 = vst [vmem:[%s833_s7 + $0x50] sm:$0xff] %v721_v18  ;;  %v451_v20 = vpop.f32.mrb[1].mxu1  ;;  %v525_v28 = vmul.f32 %v713_v17, %v713_v17  ;;  %v533_v60 = vmul.f32 %v721_v18, %v721_v18 }
 0x10a   : > { %482 = vst [vmem:[%s833_s7] sm:$0xff] %v419_v19  ;;  %v714_v21 = vpop.f32.mrb[2].mxu0  ;;  %490 = vst [vmem:[%s833_s7 + $0x40] sm:$0xff] %v451_v20  ;;  %v722_v22 = vpop.f32.mrb[2].mxu1  ;;  %v523_v25 = vmul.f32 %v419_v19, %v419_v19  ;;  %v531_v54 = vmul.f32 %v451_v20, %v451_v20 }
 0x10b   : > { %485 = vst [vmem:[%s833_s7 + $0x18] sm:$0xff] %v714_v21  ;;  %v422_v23 = vpop.f32.mrb[3].mxu0  ;;  %493 = vst [vmem:[%s833_s7 + $0x58] sm:$0xff] %v722_v22  ;;  %v454_v24 = vpop.f32.mrb[3].mxu1  ;;  %v526_v31 = vmul.f32 %v714_v21, %v714_v21  ;;  %v534_v63 = vmul.f32 %v722_v22, %v722_v22 }
 0x10c   : > { %483 = vst [vmem:[%s833_s7 + $0x8] sm:$0xff] %v422_v23  ;;  %v499_v26 = vadd.f32 %v422_v23, %v419_v19  ;;  %v524_v27 = vmul.f32 %v422_v23, %v422_v23  ;;  %491 = vst [vmem:[%s833_s7 + $0x48] sm:$0xff] %v454_v24  ;;  %v532_v59 = vmul.f32 %v454_v24, %v454_v24 }
 0x10e   : > { %v500_v29 = vadd.f32 %v713_v17, %v499_v26  ;;  %v539_v30 = vadd.f32 %v524_v27, %v523_v25  ;;  %v522_v27 = vld [vmem:[#allocation3] sm:$0x1] }
 0x110   : > { %v540_v32 = vadd.f32 %v539_v30, %v525_v28  ;;  %v717_v33 = vpop.f32.mrb[4].mxu0  ;;  %v501_v34 = vadd.f32 %v714_v21, %v500_v29  ;;  %v725_v35 = vpop.f32.mrb[4].mxu1 }
 0x111   : > { %488 = vst [vmem:[%s833_s7 + $0x30] sm:$0xff] %v717_v33  ;;  %v435_v36 = vpop.f32.mrb[5].mxu0  ;;  %496 = vst [vmem:[%s833_s7 + $0x70] sm:$0xff] %v725_v35  ;;  %v467_v37 = vpop.f32.mrb[5].mxu1  ;;  %v529_v48 = vmul.f32 %v717_v33, %v717_v33  ;;  %v537_v8 = vmul.f32 %v725_v35, %v725_v35 }
 0x112   : > { %486 = vst [vmem:[%s833_s7 + $0x20] sm:$0xff] %v435_v36  ;;  %v502_v38 = vadd.f32 %v501_v34, %v435_v36  ;;  %v527_v39 = vmul.f32 %v435_v36, %v435_v36  ;;  %v541_v40 = vadd.f32 %v540_v32, %v526_v31  ;;  %v718_v41 = vpop.f32.mrb[6].mxu0  ;;  %494 = vst [vmem:[%s833_s7 + $0x60] sm:$0xff] %v467_v37  ;;  %v726_v42 = vpop.f32.mrb[6].mxu1 }
 0x113   : > { %489 = vst [vmem:[%s833_s7 + $0x38] sm:$0xff] %v718_v41  ;;  %v438_v43 = vpop.f32.mrb[7].mxu0  ;;  %497 = vst [vmem:[%s833_s7 + $0x78] sm:$0xff] %v726_v42  ;;  %v470_v44 = vpop.f32.mrb[7].mxu1  ;;  %v530_v51 = vmul.f32 %v718_v41, %v718_v41  ;;  %v535_v2 = vmul.f32 %v467_v37, %v467_v37  ;;  %v538_v11 = vmul.f32 %v726_v42, %v726_v42 }
 0x114   : > { %v542_v45 = vadd.f32 %v541_v40, %v527_v39  ;;  %487 = vst [vmem:[%s833_s7 + $0x28] sm:$0xff] %v438_v43  ;;  %v503_v46 = vadd.f32 %v502_v38, %v438_v43  ;;  %v528_v47 = vmul.f32 %v438_v43, %v438_v43  ;;  %495 = vst [vmem:[%s833_s7 + $0x68] sm:$0xff] %v470_v44  ;;  %v573_v39 = vld [vmem:[%s902_s2] sm:$0x1] (!%p676_p5) }
 0x115   : > { %v536_v7 = vmul.f32 %v470_v44, %v470_v44 }
 0x116   : > { %v504_v49 = vadd.f32 %v717_v33, %v503_v46  ;;  %v543_v50 = vadd.f32 %v542_v45, %v528_v47 }
 0x118   : > { %v544_v52 = vadd.f32 %v543_v50, %v529_v48  ;;  %v505_v53 = vadd.f32 %v718_v41, %v504_v49 }
 0x11a   : > { %v506_v55 = vadd.f32 %v505_v53, %v451_v20  ;;  %v545_v56 = vadd.f32 %v544_v52, %v530_v51 }
 0x11c   : > { %v546_v57 = vadd.f32 %v545_v56, %v531_v54  ;;  %v507_v58 = vadd.f32 %v506_v55, %v454_v24  ;;  %v498_v24 = vld [vmem:[#allocation2] sm:$0x1] }
 0x11e   : > { %v508_v61 = vadd.f32 %v721_v18, %v507_v58  ;;  %v547_v62 = vadd.f32 %v546_v57, %v532_v59 }
 0x120   : > { %v548_v0 = vadd.f32 %v547_v62, %v533_v60  ;;  %v509_v1 = vadd.f32 %v722_v22, %v508_v61 }
 0x122   : > { %v510_v3 = vadd.f32 %v509_v1, %v467_v37  ;;  %v549_v4 = vadd.f32 %v548_v0, %v534_v63 }
 0x124   : > { %v550_v5 = vadd.f32 %v549_v4, %v535_v2  ;;  %v511_v6 = vadd.f32 %v510_v3, %v470_v44 }
 0x126   : > { %v512_v9 = vadd.f32 %v725_v35, %v511_v6  ;;  %v551_v10 = vadd.f32 %v550_v5, %v536_v7 }
 0x128   : > { %v513_v12 = vadd.f32 %v726_v42, %v512_v9  ;;  %v552_v13 = vadd.f32 %v551_v10, %v537_v8  ;;  %v578_v42 = vld [vmem:[%s903_s3] sm:$0x1] (!%p676_p5) }
 0x12a   : > { %v514_v14 = vrot.slane %v513_v12, 4  ;;  %v553_v15 = vadd.f32 %v552_v13, %v538_v11 }
 0x12c   : > { %v515_v16 = vadd.f32 %v514_v14, %v513_v12  ;;  %v554_v17 = vrot.slane %v553_v15, 4 }
 0x12e   : > { %v516_v18 = vrot.slane %v515_v16, 2  ;;  %v555_v19 = vadd.f32 %v554_v17, %v553_v15 }
 0x130   : > { %v517_v20 = vadd.f32 %v516_v18, %v515_v16  ;;  %v556_v21 = vrot.slane %v555_v19, 2 }
 0x132   : > { %v518_v22 = vrot.slane %v517_v20, 1  ;;  %v557_v23 = vadd.f32 %v556_v21, %v555_v19 }
 0x134   : > { %v519_v25 = vadd.f32 %v518_v22, %v517_v20  ;;  %v558_v26 = vrot.slane %v557_v23, 1  ;;  %565 = sbr.rel (%p676_p5) target bundleno = 348 (0x15c), region = 44 }
 0x136   : > { %v520_v28 = vadd.f32 %v519_v25, %v498_v24  ;;  %v559_v29 = vadd.f32 %v558_v26, %v557_v23 }
 0x138   : > { %521 = vst [vmem:[#allocation2] sm:$0x1] %v520_v28  ;;  %v560_v30 = vadd.f32 %v559_v29, %v522_v27 }
 0x13a   : > { %561 = vst [vmem:[#allocation3] sm:$0x1] %v560_v30 }
 0x13f   : > { %v566_v31 = vld [vmem:[#allocation2] sm:$0x1] }
 0x140   : > { %v567_v33 = vmul.f32 0.001953125, %v566_v31 }
 0x141   : > { %v568_v32 = vld [vmem:[#allocation3] sm:$0x1] }
 0x142   : > { %v569_v34 = vmul.f32 0.001953125, %v568_v32  ;;  %v570_v35 = vmul.f32 %v567_v33, %v567_v33 }
 0x144   : > { %v571_v36 = vsub.f32 %v569_v34, %v570_v35 }
 0x146   : > { %v572_v37 = vmax.f32 %v571_v36, 0.0 }
 0x148   : > { %v574_v38 = vadd.f32 1e-05, %v572_v37 }
 0x14a   : > { %768 = vrsqrt.f32 %v574_v38 }
 0x154   : > { %v769_v40 = vpop.eup %768 }
 0x155   : > { %v576_v41 = vmul.f32 %v769_v40, %v573_v39 }
 0x157   : > { %577 = vst [vmem:[%s905_s5] sm:$0x1] %v576_v41  ;;  %v579_v43 = vmul.f32 %v576_v41, %v567_v33 }
 0x159   : > { %v580_v44 = vsub.f32 %v578_v42, %v579_v43 }
 0x15b   : > { %581 = vst [vmem:[%s906_s6] sm:$0x1] %v580_v44 }
 0x15c PF: > { %s17_s21 = sadd.s32 1, %s776_s21  }
 0x15d   : > { %p14_p6 = scmp.ge.s32.totalorder %s17_s21, 6  }
 0x15f   :  { %16 = sbr.rel (!%p14_p6) target bundleno = 1 (0x1), region = 90 }

</bundles_post_ra>
